<compile_context>
chip_gen: v5e
topology: v5e:2x2
jax: 0.10.0
libtpu: 0.0.40
codegen_flags: <defaults>
</compile_context>

<pallas_src>
import functools

import jax
import jax.numpy as jnp
from jax.experimental import pallas as pl
from jax.experimental.pallas import tpu as pltpu

_INV_SQRT2 = 0.7071067811865476


def _round_up(x, m):
    return ((x + m - 1) // m) * m


def _choose_seq_tile(seq, din_p, dout_p, max_ts=512, budget_bytes=24 * 2**20):
    """Largest row tile keeping double-buffered x/out blocks inside a VMEM budget."""
    if seq <= max_ts:
        ts = seq                            # full dim -> always a legal block
    else:
        ts = max(8, (max_ts // 8) * 8)      # multiple of 8; ragged tail is masked
    while ts > 8 and 2 * 2 * ts * (din_p + dout_p) * 4 > budget_bytes:
        ts = max(8, (ts // 2 // 8) * 8)
    return ts


def _mod_mlp_kernel(cond_ref, x_ref, wt_ref, b_ref, o_ref, *, mlp_depth):
    """mlp_depth x ((act * cond) @ W^T + b -> GELU); activation stays resident."""
    cond = cond_ref[...].astype(jnp.float32)        # (1, din_p)   resident
    wt = wt_ref[...].astype(jnp.float32)            # (din_p, dout_p) resident
    b = b_ref[...].astype(jnp.float32)              # (1, dout_p)  resident
    act = x_ref[...].astype(jnp.float32)            # (TS, din_p)  streamed tile

    for _ in range(mlp_depth):                      # static unroll; weights shared
        h = act * cond                              # broadcast over rows (VPU)
        out = jax.lax.dot_general(                  # MXU: contract din vs rhs dim 0
            h, wt,
            dimension_numbers=(((1,), (0,)), ((), ())),
            preferred_element_type=jnp.float32,
        ) + b
        # Exact GELU (erf form) — matches torch.nn.GELU() default.
        act = 0.5 * out * (1.0 + jax.lax.erf(out * jnp.float32(_INV_SQRT2)))

    o_ref[...] = act.astype(o_ref.dtype)


def mod_mlp(x, code, w_c, W, b, mlp_depth, *, ln_gamma=None, ln_beta=None,
            ln_eps=1e-5, max_seq_tile=512):
    """ModMLP forward: mlp_depth x (ModLin2D -> GELU), weights shared as in PyTorch."""
    nf, seq, din = x.shape
    dout, din_w = W.shape
    if din_w != din:
        raise ValueError("W must be (dout, din)")
    if mlp_depth > 1 and din != dout:
        raise ValueError("shared weights across depth require din == dout")

    # ---- hoisted conditioning: LayerNorm((w_c @ code).T); identical for all
    #      layers and all grid tiles, so compute it once in plain JAX.
    cond = jnp.matmul(w_c.astype(jnp.float32), code.astype(jnp.float32)).T  # (nf, din)
    mean = jnp.mean(cond, axis=-1, keepdims=True)
    var = jnp.mean(jnp.square(cond - mean), axis=-1, keepdims=True)
    cond = (cond - mean) * jax.lax.rsqrt(var + jnp.float32(ln_eps))
    if ln_gamma is not None:
        cond = cond * ln_gamma.astype(jnp.float32)
    if ln_beta is not None:
        cond = cond + ln_beta.astype(jnp.float32)

    # ---- lane padding to multiples of 128 (zero-pad; no-op when aligned).
    din_p = _round_up(din, 128)
    dout_p = _round_up(dout, 128)
    x_p = jnp.pad(x, ((0, 0), (0, 0), (0, din_p - din)))
    cond_p = jnp.pad(cond, ((0, 0), (0, din_p - din)))[:, None, :]       # (nf,1,din_p)
    wt_p = jnp.pad(W.T, ((0, din_p - din), (0, dout_p - dout)))          # (din_p,dout_p)
    b_p = jnp.pad(b, (0, dout_p - dout))[None, :]                        # (1,dout_p)

    # ---- row tiling over the sequence axis, grid over (frame, seq tile).
    ts = _choose_seq_tile(seq, din_p, dout_p, max_ts=max_seq_tile)
    grid = (nf, pl.cdiv(seq, ts))

    in_specs = [
        pl.BlockSpec((None, 1, din_p), lambda n, s: (n, 0, 0)),    # cond row
        pl.BlockSpec((None, ts, din_p), lambda n, s: (n, s, 0)),   # x (streamed)
        pl.BlockSpec((din_p, dout_p), lambda n, s: (0, 0)),        # W^T (resident)
        pl.BlockSpec((1, dout_p), lambda n, s: (0, 0)),            # bias (resident)
    ]
    out_specs = pl.BlockSpec((None, ts, dout_p), lambda n, s: (n, s, 0))

    # VMEM budget: double-buffered stream tiles + resident operands + temporaries.
    vmem_needed = 4 * (
        2 * ts * (din_p + dout_p)        # double-buffered x / out blocks
        + 2 * din_p * dout_p             # W^T buffers
        + 2 * (din_p + dout_p)           # cond row + bias
        + 3 * ts * max(din_p, dout_p)    # kernel temporaries headroom
    )
    vmem_limit = int(min(64 * 2**20, max(vmem_needed, 16 * 2**20)))

    cost = pl.CostEstimate(
        flops=2 * mlp_depth * nf * seq * din_p * dout_p,
        transcendentals=mlp_depth * nf * seq * dout_p,
        bytes_accessed=4 * (nf * seq * (din_p + dout_p)
                            + din_p * dout_p + nf * din_p + dout_p),
    )

    out_p = pl.pallas_call(
        functools.partial(_mod_mlp_kernel, mlp_depth=mlp_depth),
        out_shape=jax.ShapeDtypeStruct((nf, seq, dout_p), x.dtype),
        grid=grid,
        in_specs=in_specs,
        out_specs=out_specs,
        compiler_params=pltpu.CompilerParams(
            dimension_semantics=("parallel", "parallel"),
            vmem_limit_bytes=vmem_limit,
        ),
        cost_estimate=cost,
    )(cond_p, x_p, wt_p, b_p)

    return out_p[..., :dout]


def _reference(x, code, w_c, W, b, mlp_depth, ln_gamma, ln_beta, eps=1e-5):
    """Plain-JAX reference mirroring the PyTorch forward."""
    out = x
    for _ in range(mlp_depth):
        cond = (w_c @ code).T                                   # (nf, din)
        mean = jnp.mean(cond, axis=-1, keepdims=True)
        var = jnp.mean((cond - mean) ** 2, axis=-1, keepdims=True)
        cond = (cond - mean) / jnp.sqrt(var + eps)
        cond = cond * ln_gamma + ln_beta
        h = out * cond[:, None, :]
        h = jnp.einsum("nsd,od->nso", h, W) + b
        out = 0.5 * h * (1.0 + jax.lax.erf(h / jnp.sqrt(2.0)))
    return out


if __name__ == "__main__":
    # Small shapes consistent with the module (din == dout required by the
    # PyTorch module for depth > 1 since W and w_c are shared across layers).
    nf, seq = 4, 8
    din = dout = 32
    dcond = 16
    mlp_depth = 2

    key = jax.random.PRNGKey(0)
    kx, kc, kwc, kw, kb, kg, kbt = jax.random.split(key, 7)
    x = jax.random.normal(kx, (nf, seq, din), dtype=jnp.float32)
    code = jax.random.normal(kc, (dcond, nf), dtype=jnp.float32)
    w_c = jax.random.normal(kwc, (din, dcond), dtype=jnp.float32) * 0.1
    W = jax.random.normal(kw, (dout, din), dtype=jnp.float32) * 0.1
    b = jax.random.normal(kb, (dout,), dtype=jnp.float32) * 0.1
    # LayerNorm affine parameters (torch default elementwise_affine=True).
    ln_gamma = 1.0 + 0.1 * jax.random.normal(kg, (din,), dtype=jnp.float32)
    ln_beta = 0.1 * jax.random.normal(kbt, (din,), dtype=jnp.float32)

    out = mod_mlp(x, code, w_c, W, b, mlp_depth,
                  ln_gamma=ln_gamma, ln_beta=ln_beta)
    out = jax.block_until_ready(out)

    ref = _reference(x, code, w_c, W, b, mlp_depth, ln_gamma, ln_beta)
    assert out.shape == (nf, seq, dout)
    assert jnp.allclose(out, ref, atol=1e-4, rtol=1e-4), "mismatch vs reference"

    print("KERNEL_OK")
</pallas_src>

<mosaic_0001>
module attributes {stable_mosaic.version = 11 : i64} {
  func.func @_mod_mlp_kernel(%arg0: i32, %arg1: i32, %arg2: memref<1x1x128xf32, #tpu.memory_space<vmem>>, %arg3: memref<1x8x128xf32, #tpu.memory_space<vmem>>, %arg4: memref<128x128xf32, #tpu.memory_space<vmem>>, %arg5: memref<1x128xf32, #tpu.memory_space<vmem>>, %arg6: memref<1x8x128xf32, #tpu.memory_space<vmem>>) attributes {dimension_semantics = [#tpu.dimension_semantics<parallel>, #tpu.dimension_semantics<parallel>], iteration_bounds = array<i64: 4, 1>, scalar_prefetch = 0 : i64, scratch_operands = 0 : i64, tpu.core_type = #tpu.core_type<tc>, window_params = [{transform_indices = @transform_0, window_bounds = array<i64: 1, 1, 128>}, {transform_indices = @transform_1, window_bounds = array<i64: 1, 8, 128>}, {pipeline_mode = #tpu.pipeline_mode<synchronous>, transform_indices = @transform_2, window_bounds = array<i64: 128, 128>}, {pipeline_mode = #tpu.pipeline_mode<synchronous>, transform_indices = @transform_3, window_bounds = array<i64: 1, 128>}, {transform_indices = @transform_4, window_bounds = array<i64: 1, 8, 128>}]} {
    %c0 = arith.constant 0 : index
    %c0_0 = arith.constant 0 : index
    %c0_1 = arith.constant 0 : index
    %0 = vector.load %arg2[%c0, %c0_0, %c0_1] : memref<1x1x128xf32, #tpu.memory_space<vmem>>, vector<1x1x128xf32>
    %1 = vector.shape_cast %0 : vector<1x1x128xf32> to vector<1x128xf32>
    %c0_2 = arith.constant 0 : index
    %c0_3 = arith.constant 0 : index
    %2 = vector.load %arg4[%c0_2, %c0_3] : memref<128x128xf32, #tpu.memory_space<vmem>>, vector<128x128xf32>
    %c0_4 = arith.constant 0 : index
    %c0_5 = arith.constant 0 : index
    %3 = vector.load %arg5[%c0_4, %c0_5] : memref<1x128xf32, #tpu.memory_space<vmem>>, vector<1x128xf32>
    %c0_6 = arith.constant 0 : index
    %c0_7 = arith.constant 0 : index
    %c0_8 = arith.constant 0 : index
    %4 = vector.load %arg3[%c0_6, %c0_7, %c0_8] : memref<1x8x128xf32, #tpu.memory_space<vmem>>, vector<1x8x128xf32>
    %5 = vector.shape_cast %4 : vector<1x8x128xf32> to vector<8x128xf32>
    %6 = vector.broadcast %1 : vector<1x128xf32> to vector<8x128xf32>
    %7 = arith.mulf %5, %6 : vector<8x128xf32>
    %cst = arith.constant dense<0.000000e+00> : vector<8x128xf32>
    %8 = tpu.matmul %7, %2, %cst {dimension_numbers = #tpu.dot_dimension_numbers<[1], [0], [0], [1], [0, 0, 1, 1], [], []>} : vector<8x128xf32>, vector<128x128xf32>, vector<8x128xf32> -> vector<8x128xf32>
    %9 = vector.broadcast %3 : vector<1x128xf32> to vector<8x128xf32>
    %10 = arith.addf %8, %9 : vector<8x128xf32>
    %cst_9 = arith.constant 5.000000e-01 : f32
    %11 = vector.broadcast %cst_9 : f32 to vector<8x128xf32>
    %12 = arith.mulf %11, %10 : vector<8x128xf32>
    %cst_10 = arith.constant 0.707106769 : f32
    %13 = vector.broadcast %cst_10 : f32 to vector<8x128xf32>
    %14 = arith.mulf %10, %13 : vector<8x128xf32>
    %15 = math.erf %14 : vector<8x128xf32>
    %cst_11 = arith.constant 1.000000e+00 : f32
    %16 = vector.broadcast %cst_11 : f32 to vector<8x128xf32>
    %17 = arith.addf %16, %15 : vector<8x128xf32>
    %18 = arith.mulf %12, %17 : vector<8x128xf32>
    %19 = vector.broadcast %1 : vector<1x128xf32> to vector<8x128xf32>
    %20 = arith.mulf %18, %19 : vector<8x128xf32>
    %cst_12 = arith.constant dense<0.000000e+00> : vector<8x128xf32>
    %21 = tpu.matmul %20, %2, %cst_12 {dimension_numbers = #tpu.dot_dimension_numbers<[1], [0], [0], [1], [0, 0, 1, 1], [], []>} : vector<8x128xf32>, vector<128x128xf32>, vector<8x128xf32> -> vector<8x128xf32>
    %22 = vector.broadcast %3 : vector<1x128xf32> to vector<8x128xf32>
    %23 = arith.addf %21, %22 : vector<8x128xf32>
    %cst_13 = arith.constant 5.000000e-01 : f32
    %24 = vector.broadcast %cst_13 : f32 to vector<8x128xf32>
    %25 = arith.mulf %24, %23 : vector<8x128xf32>
    %cst_14 = arith.constant 0.707106769 : f32
    %26 = vector.broadcast %cst_14 : f32 to vector<8x128xf32>
    %27 = arith.mulf %23, %26 : vector<8x128xf32>
    %28 = math.erf %27 : vector<8x128xf32>
    %cst_15 = arith.constant 1.000000e+00 : f32
    %29 = vector.broadcast %cst_15 : f32 to vector<8x128xf32>
    %30 = arith.addf %29, %28 : vector<8x128xf32>
    %31 = arith.mulf %25, %30 : vector<8x128xf32>
    %c0_16 = arith.constant 0 : index
    %c0_17 = arith.constant 0 : index
    %c0_18 = arith.constant 0 : index
    %32 = vector.load %arg6[%c0_16, %c0_17, %c0_18] : memref<1x8x128xf32, #tpu.memory_space<vmem>>, vector<1x8x128xf32>
    %33 = vector.shape_cast %32 : vector<1x8x128xf32> to vector<8x128xf32>
    %34 = vector.shape_cast %31 : vector<8x128xf32> to vector<1x8x128xf32>
    tpu.vector_store %arg6[%c0_16, %c0_17, %c0_18], %34 {strides = array<i32>} : memref<1x8x128xf32, #tpu.memory_space<vmem>>, vector<1x8x128xf32>,
    return
  }
  func.func @transform_0(%arg0: i32, %arg1: i32) -> (i32, i32, i32) {
    %c0_i32 = arith.constant 0 : i32
    %c0_i32_0 = arith.constant 0 : i32
    %c0_i32_1 = arith.constant 0 : i32
    return %arg0, %c0_i32, %c0_i32_0 : i32, i32, i32
  }
  func.func @transform_1(%arg0: i32, %arg1: i32) -> (i32, i32, i32) {
    %c0_i32 = arith.constant 0 : i32
    %c0_i32_0 = arith.constant 0 : i32
    return %arg0, %arg1, %c0_i32 : i32, i32, i32
  }
  func.func @transform_2(%arg0: i32, %arg1: i32) -> (i32, i32) {
    %c0_i32 = arith.constant 0 : i32
    %c0_i32_0 = arith.constant 0 : i32
    %c0_i32_1 = arith.constant 0 : i32
    return %c0_i32, %c0_i32_0 : i32, i32
  }
  func.func @transform_3(%arg0: i32, %arg1: i32) -> (i32, i32) {
    %c0_i32 = arith.constant 0 : i32
    %c0_i32_0 = arith.constant 0 : i32
    %c0_i32_1 = arith.constant 0 : i32
    return %c0_i32, %c0_i32_0 : i32, i32
  }
  func.func @transform_4(%arg0: i32, %arg1: i32) -> (i32, i32, i32) {
    %c0_i32 = arith.constant 0 : i32
    %c0_i32_0 = arith.constant 0 : i32
    return %arg0, %arg1, %c0_i32 : i32, i32, i32
  }
}

</mosaic_0001>

<bundles_post_ra>
// kernel: tpu_custom_call.1
= control target key start
LH: loop header
LB: loop body
LE: loop exit
PB: predicated region body
PF: predicated region fallthrough
CT: control target
= control target key end

     0   :  { %s1041_s0 = inlined_call_operand.hbm [shape: f32[4,1,128], index: 0, kind: input, shape index: {}]   ;;  %s1042_s1 = inlined_call_operand.hbm [shape: f32[4,8,128], index: 1, kind: input, shape index: {}]   ;;  %s1043_s2 = inlined_call_operand.hbm [shape: f32[128,128], index: 2, kind: input, shape index: {}]   ;;  %s1044_s3 = inlined_call_operand.vmem [shape: f32[1,128], index: 3, kind: input, shape index: {}]   ;;  %s1045_s4 = inlined_call_operand.hbm [shape: f32[4,8,128], index: 4, kind: output, shape index: {}]  }
   0x1   :  { %1048 = sst [smem:[#allocation16_spill]] %s1043_s2 }
   0x2   :  { %9 = vsyncpa [#allocation3], 0 }
   0x3   :  { %11 = vsyncpa [#allocation3 + $0x1], 0 }
   0x4   :  { %12 = vsyncpa [#allocation6], 0 }
   0x5   :  { %14 = vsyncpa [#allocation6 + $0x1], 0 }
   0x6   :  { %15 = vsyncpa [#allocation4], 0 }
   0x7   :  { %17 = vsyncpa [#allocation4 + $0x1], 0  ;;  %s877_s15 = smov 0   ;;  %s879_s16 = smov 0  }
   0x8   :  { %s881_s17 = smov 0   ;;  %s883_s18 = smov 0  }
   0x9   :  { %s885_s19 = smov 0   ;;  %s887_s20 = smov 0  }
   0xa LB: > { %1049 = sst [smem:[#allocation13_spill]] %s835_s17  ;;  %s908_s21 = sadd.s32 4294967295, %s847_s20   ;;  %s847_s20 = sphi %s887_s20, %s23_s20   ;;  %s843_s19 = sphi %s885_s19, %s1064_s19   ;;  %s839_s18 = sphi %s883_s18, %s1063_s18   ;;  %s835_s17 = sphi %s881_s17, %s1059_s17   ;;  %s831_s16 = sphi %s879_s16, %s1062_s16   ;;  %s827_s15 = sphi %s877_s15, %s1061_s15  }
   0xb   : > { %p566_p0 = scmp.ge.s32.totalorder %s847_s20, 1  ;;  %p56_p1 = scmp.eq.s32.totalorder %s908_s21, 0 }
   0xc   : > { %p164_p2 = scmp.lt.s32.totalorder %s847_s20, 5  ;;  %s1050_s2 = sld [smem:[#allocation16_spill]] }
   0xd   : > { %s849_s26 = smov [#allocation7]   ;;  %s850_s28 = smov 128  }
   0xe   : > { %p916_p3 = pnand %p566_p0, %p164_p2  ;;  %s177_s27 = sshll.u32 %s849_s26, 4  ;;  %s178_s27 = int_to_ptr.vmem [resolvable:$true] %s177_s27 }
   0xf   : > { %s851_s29 = smov 8   ;;  %s565_s30 = sadd.s32 4294967294, %s847_s20  }
  0x10   : > { %p591_p4 = pneg %p916_p3  ;;  %s35_s5 = sadd.s32 1, %s843_s19 }
  0x11   : > { %s42_s6 = sadd.s32 1, %s835_s17  ;;  %p37_p6 = scmp.ge.s32.totalorder %s35_s5, 4 }
  0x12   : > { %s175_s24 = sshll.u32 %s1050_s2, 4  ;;  %p592_p5 = pnand %p591_p4, %p56_p1  ;;  %s176_s24 = int_to_ptr.hbm [resolvable:$true] %s175_s24 }
  0x13   : > { %p49_p7 = scmp.ne.s32.totalorder %s835_s17, %s831_s16  ;;  %p50_p8 = scmp.eq.s32.totalorder %s847_s20, 0 }
  0x14   : > { %594 = dma.hbm_to_vmem [thread:$0]  (!%p592_p5), %s176_s24, 2048, %s178_s27, [#allocation6], %s850_s28, %s850_s28, %s851_s29  }
  0x15   : > { %p55_p9 = scmp.ne.s32.totalorder %s831_s16, %s827_s15  ;;  %s1066_s5 = smov (%p37_p6, %s35_s5), 0 }
  0x16   : > { %1052 = sst [smem:[#allocation14_spill]] %s1066_s5  ;;  %p934_p10 = por %p50_p8, %p49_p7 }
  0x17   : > { %p940_p11 = por %p56_p1, %p55_p9  ;;  %s39_s9 = ssub.s32 %s843_s19, %s1066_s5 }
  0x18   : > { %p151_p12 = scmp.eq.s32.totalorder %s908_s21, 3  ;;  %p40_p13 = scmp.eq.s32.totalorder %s39_s9, 0 }
  0x19   : > { %p157_p0 = scmp.eq.s32.totalorder %s565_s30, 3  ;;  %p607_p4 = scmp.lt.s32.totalorder %s847_s20, 4 }
  0x1a   : > { %p947_p2 = por %p151_p12, %p49_p7  ;;  %s194_s13 = sand.u32 1, %s835_s17  }
  0x1b   : > { %s953_s11 = scalar_select %p40_p13, %s835_s17, %s42_s6  }
  0x1c   : > { %p955_p5 = por %p157_p0, %p55_p9  ;;  %s200_s23 = scalar_lea.hbm %s1041_s0, %s843_s19 }
  0x1d   : > { %1056 = sst [smem:[#allocation15_spill]] %s953_s11  ;;  %s197_s24 = scalar_lea.vmem [#allocation2], %s194_s13 }
  0x1e   : > { %s204_s26 = sshll.u32 %s197_s24, 4  ;;  %s202_s27 = sshll.u32 %s200_s23, 4  ;;  %s205_s26 = int_to_ptr.vmem [resolvable:$true] %s204_s26  ;;  %s203_s27 = int_to_ptr.hbm [resolvable:$true] %s202_s27 }
  0x1f   : > { %p596_p6 = pnand %p607_p4, %p934_p10  ;;  %s211_s28 = sand.u32 1, %s847_s20  }
  0x20   : > { %s569_s29 = sshll.u32 %s194_s13, 3  ;;  %s195_s30 = scalar_lea.sflag [#allocation3], %s194_s13 }
  0x21   : > { %598 = dma.hbm_to_vmem [thread:$0]  (!%p596_p6), %s203_s27, 16, %s205_s26, %s195_s30  }
  0x22   : > { %s570_s6 = sshll.u32 %s843_s19, 3  ;;  %s215_s11 = scalar_lea.vmem [#allocation5], %s569_s29 }
  0x23   : > { %s220_s5 = scalar_lea.hbm %s1042_s1, %s570_s6  ;;  %s224_s17 = sshll.u32 %s215_s11, 4  ;;  %s225_s17 = int_to_ptr.vmem [resolvable:$true] %s224_s17 }
  0x24   : > { %s222_s14 = sshll.u32 %s220_s5, 4  ;;  %s212_s22 = scalar_lea.sflag [#allocation6], %s211_s28  ;;  %s223_s14 = int_to_ptr.hbm [resolvable:$true] %s222_s14 }
  0x25   : > { %601 = dma.hbm_to_vmem [thread:$0]  (!%p596_p6), %s223_s14, 128, %s225_s17, %s212_s22  }
  0x26   : > { %233 = sbr.rel (%p916_p3) target bundleno = 444 (0x1bc), region = 36  ;;  %s974_s7 = sand.u32 (!%p916_p3), 1, %s831_s16  }
  0x27   : > { %s236_s13 = scalar_lea.sflag (!%p916_p3), [#allocation3], %s974_s7  ;;  %s238_s23 = scalar_lea.vmem (!%p916_p3), [#allocation2], %s974_s7 }
  0x2b   : > { %810 = dma.done.wait (%p940_p11), %s236_s13, 16  }
  0x2c   : > { %812 = vsyncadd (%p940_p11), %s236_s13, 4294967280  ;;  %s244_s2 = sand.u32 1, %s908_s21   ;;  %s572_s17 = sshll.u32 %s974_s7, 3 }
  0x2d   : > { %s245_s25 = scalar_lea.sflag [#allocation6], %s244_s2  ;;  %s986_s5 = scalar_lea.vmem [#allocation5], %s572_s17 }
  0x2e   : > { %814 = dma.done.wait (%p940_p11), %s245_s25, 128  }
  0x2f   : > { %816 = vsyncadd (%p940_p11), %s245_s25, 4294967168 }
  0x30   : > { %818 = dma.done.wait (%p56_p1), [#allocation6], 2048  }
  0x31   : > { %820 = vsyncadd (%p56_p1), [#allocation6], 4294965248  ;;  %v299_v0 = vld [vmem:[#allocation7 + $0x78] sm:$0xff]  ;;  %v298_v1 = vld [vmem:[#allocation7 + $0x70] sm:$0xff]  ;;  %s578_s11 = sshll.u32 %s839_s18, 3  ;;  %s282_s28 = scalar_lea.vmem [#allocation8], %s572_s17 }
  0x32   : > { %309 = vmatpush.msra.mxu0 %v299_v0  ;;  %374 = vmatpush.msra.mxu1 %v299_v0  ;;  %v297_v2 = vld [vmem:[#allocation7 + $0x68] sm:$0xff]  ;;  %v296_v3 = vld [vmem:[#allocation7 + $0x60] sm:$0xff]  ;;  %v295_v4 = vld [vmem:[#allocation7 + $0x58] sm:$0xff]  ;;  %s451_s27 = scalar_lea.hbm %s1045_s4, %s578_s11  ;;  %s453_s29 = sshll.u32 %s282_s28, 4  ;;  %s454_s29 = int_to_ptr.vmem [resolvable:$true] %s453_s29 }
  0x33   : > { %v294_v5 = vld [vmem:[#allocation7 + $0x50] sm:$0xff]  ;;  %v293_v6 = vld [vmem:[#allocation7 + $0x48] sm:$0xff]  ;;  %v292_v7 = vld [vmem:[#allocation7 + $0x40] sm:$0xff]  ;;  %s455_s30 = sshll.u32 %s451_s27, 4  ;;  %s440_s18 = scalar_lea.sflag [#allocation4], %s974_s7  ;;  %s456_s30 = int_to_ptr.hbm [resolvable:$true] %s455_s30 }
  0x34   : > { %310 = vmatpush.msra.mxu0 %v298_v1  ;;  %375 = vmatpush.msra.mxu1 %v298_v1  ;;  %v291_v8 = vld [vmem:[#allocation7 + $0x38] sm:$0xff]  ;;  %v290_v9 = vld [vmem:[#allocation7 + $0x30] sm:$0xff]  ;;  %v289_v10 = vld [vmem:[#allocation7 + $0x28] sm:$0xff]  ;;  %s771_s6 = sshra.s32 %s456_s30, 4  ;;  %s777_s13 = scalar_lea.hbm %s1045_s4, 32  ;;  %s772_s6 = int_to_ptr.hbm [resolvable:$true] %s771_s6 }
  0x35   : > { %v288_v11 = vld [vmem:[#allocation7 + $0x20] sm:$0xff]  ;;  %v287_v12 = vld [vmem:[#allocation7 + $0x18] sm:$0xff]  ;;  %v286_v13 = vld [vmem:[#allocation7 + $0x10] sm:$0xff]  ;;  %s773_s9 = scalar_lea.hbm %s772_s6, 8  ;;  %p778_p8 = scmp.lt.s32.totalorder %s772_s6, %s1045_s4 }
  0x36   : > { %311 = vmatpush.msra.mxu0 %v297_v2  ;;  %376 = vmatpush.msra.mxu1 %v297_v2  ;;  %v661_v14 = vld [vmem:[%s238_s23] ss:$0 sm:$0xff]  ;;  %v301_v15 = vld [vmem:[%s986_s5] sm:$0xff]  ;;  %v284_v17 = vld [vmem:[#allocation7] sm:$0xff]  ;;  %p774_p1 = scmp.ne.s32.totalorder %s772_s6, %s773_s9  ;;  %p779_p9 = scmp.lt.s32.totalorder %s777_s13, %s773_s9 }
  0x37   : > { %v285_v16 = vld [vmem:[#allocation7 + $0x8] sm:$0xff]  ;;  %v305_v18 = vmul.f32 %v661_v14, %v301_v15 }
  0x38   : > { %312 = vmatpush.msra.mxu0 %v296_v3  ;;  %377 = vmatpush.msra.mxu1 %v296_v3  ;;  %v662_v19 = vld [vmem:[%s1044_s3] ss:$0 sm:$0xff]  ;;  %p775_p3 = pnand %p774_p1, %p947_p2  ;;  %p780_p10 = por %p779_p9, %p778_p8 }
  0x3a   : > { %313 = vmatpush.msra.mxu0 %v295_v4  ;;  %378 = vmatpush.msra.mxu1 %v295_v4  ;;  %p776_p7 = pneg %p775_p3 }
  0x3c   : > { %314 = vmatpush.msra.mxu0 %v294_v5  ;;  %379 = vmatpush.msra.mxu1 %v294_v5  ;;  %p781_p11 = pnand %p780_p10, %p776_p7 }
  0x3e   : > { %315 = vmatpush.msra.mxu0 %v293_v6  ;;  %380 = vmatpush.msra.mxu1 %v293_v6 }
  0x40   : > { %316 = vmatpush.msra.mxu0 %v292_v7  ;;  %381 = vmatpush.msra.mxu1 %v292_v7 }
  0x42   : > { %317 = vmatpush.msra.mxu0 %v291_v8  ;;  %382 = vmatpush.msra.mxu1 %v291_v8 }
  0x44   : > { %318 = vmatpush.msra.mxu0 %v290_v9  ;;  %383 = vmatpush.msra.mxu1 %v290_v9 }
  0x46   : > { %319 = vmatpush.msra.mxu0 %v289_v10  ;;  %384 = vmatpush.msra.mxu1 %v289_v10 }
  0x48   : > { %320 = vmatpush.msra.mxu0 %v288_v11  ;;  %385 = vmatpush.msra.mxu1 %v288_v11 }
  0x4a   : > { %321 = vmatpush.msra.mxu0 %v287_v12  ;;  %386 = vmatpush.msra.mxu1 %v287_v12 }
  0x4c   : > { %322 = vmatpush.msra.mxu0 %v286_v13  ;;  %387 = vmatpush.msra.mxu1 %v286_v13 }
  0x4e   : > { %323 = vmatpush.msra.mxu0 %v285_v16  ;;  %388 = vmatpush.msra.mxu1 %v285_v16 }
  0x50   : > { %324 = vmatpush.msra.mxu0 %v284_v17  ;;  %389 = vmatpush.msra.mxu1 %v284_v17 }
  0x51   : > { %325 = vmatmul.f32.vlgmr.msra.gmra.mxu0 %v305_v18 }
  0xce   : > { %v326_v20 = vpop.f32.mrf.mxu0 }
  0xcf   : > { %v327_v21 = vadd.f32 %v662_v19, %v326_v20 }
  0xd1   : > { %v330_v22 = vmul.f32 0.70710677, %v327_v21  ;;  %v329_v58 = vmul.f32 0.5, %v327_v21 }
  0xd3   : > { %v331_v23 = vmul.f32 %v330_v22, %v330_v22 }
  0xd5   : > { %v332_v24 = vmin.f32 %v331_v23, 16.0 }
  0xd7   : > { %v333_v25 = vmul.f32 2.1237322e-06, %v332_v24  ;;  %v344_v26 = vmul.f32 3.8918573e-05, %v332_v24 }
  0xd9   : > { %v334_v27 = vadd.f32 0.00028619796, %v333_v25  ;;  %v345_v28 = vadd.f32 0.001143296, %v344_v26 }
  0xdb   : > { %v335_v29 = vmul.f32 %v334_v27, %v332_v24  ;;  %v346_v30 = vmul.f32 %v345_v28, %v332_v24 }
  0xdd   : > { %v347_v31 = vadd.f32 0.014752088, %v346_v30  ;;  %v336_v32 = vadd.f32 0.0036580483, %v335_v29 }
  0xdf   : > { %v348_v33 = vmul.f32 %v347_v31, %v332_v24  ;;  %v337_v35 = vmul.f32 %v336_v32, %v332_v24 }
  0xe1   : > { %v349_v34 = vadd.f32 0.112945676, %v348_v33  ;;  %v338_v38 = vadd.f32 0.05243302, %v337_v35 }
  0xe3   : > { %v350_v36 = vmul.f32 %v349_v34, %v332_v24  ;;  %v339_v41 = vmul.f32 %v338_v38, %v332_v24 }
  0xe5   : > { %v351_v37 = vadd.f32 0.4994258, %v350_v36  ;;  %v340_v42 = vadd.f32 0.18741608, %v339_v41 }
  0xe7   : > { %v352_v39 = vmul.f32 %v351_v37, %v332_v24  ;;  %v341_v44 = vmul.f32 %v340_v42, %v332_v24 }
  0xe9   : > { %v353_v40 = vadd.f32 1.0, %v352_v39  ;;  %v342_v48 = vadd.f32 1.1283791, %v341_v44 }
  0xeb   : > { %663 = vrcp.f32 %v353_v40  ;;  %v365_v47 = vand.u32 2147483648, %v353_v40  ;;  %v363_v50 = vand.u32 2147483647, %v353_v40  ;;  %vm359_vm1 = vweird.f32 %v353_v40 }
  0xec   : > { %v343_v53 = vmul.f32 %v342_v48, %v330_v22 }
  0xed   : > { %v366_v52 = vor.u32 1.1754944e-38, %v365_v47  ;;  %vm364_vm3 = vcmp.eq.f32.partialorder %v363_v50, 8.507059e+37 }
  0xf1   : > { %v664_v43 = vpop.eup %663 }
  0xf2   : > { %v355_v45 = vmul.f32 %v664_v43, %v353_v40  ;;  %vm360_vm0 = vweird.f32 %v664_v43 }
  0xf3   : > { %vm361_vm2 = vmor %vm359_vm1, %vm360_vm0 }
  0xf4   : > { %v356_v46 = vsub.f32 1.0, %v355_v45 }
  0xf6   : > { %v357_v49 = vmul.f32 %v664_v43, %v356_v46 }
  0xf8   : > { %v358_v51 = vadd.f32 %v664_v43, %v357_v49 }
  0xfa   : > { %v362_v54 = vsel %vm361_vm2, %v664_v43, %v358_v51 }
  0xfb   : > { %v367_v55 = vsel %vm364_vm3, %v366_v52, %v362_v54 }
  0xfc   : > { %v368_v56 = vmul.f32 %v367_v55, %v343_v53 }
  0xfe   : > { %v575_v57 = vclamps-f32 %v368_v56, 1.0 }
 0x100   : > { %v371_v59 = vadd.f32 1.0, %v575_v57 }
 0x102   : > { %v372_v60 = vmul.f32 %v371_v59, %v329_v58 }
 0x104   : > { %v373_v61 = vmul.f32 %v661_v14, %v372_v60 }
 0x106   : > { %390 = vmatmul.f32.vlgmr.msra.gmra.mxu1 %v373_v61 }
 0x183   : > { %v391_v62 = vpop.f32.mrf.mxu1 }
 0x184   : > { %v392_v63 = vadd.f32 %v662_v19, %v391_v62 }
 0x186   : > { %v395_v0 = vmul.f32 0.70710677, %v392_v63  ;;  %v394_v36 = vmul.f32 0.5, %v392_v63 }
 0x188   : > { %v396_v1 = vmul.f32 %v395_v0, %v395_v0 }
 0x18a   : > { %v397_v2 = vmin.f32 %v396_v1, 16.0 }
 0x18c   : > { %v398_v3 = vmul.f32 2.1237322e-06, %v397_v2  ;;  %v409_v4 = vmul.f32 3.8918573e-05, %v397_v2 }
 0x18e   : > { %v399_v5 = vadd.f32 0.00028619796, %v398_v3  ;;  %v410_v6 = vadd.f32 0.001143296, %v409_v4 }
 0x190   : > { %v400_v7 = vmul.f32 %v399_v5, %v397_v2  ;;  %v411_v8 = vmul.f32 %v410_v6, %v397_v2 }
 0x192   : > { %v412_v9 = vadd.f32 0.014752088, %v411_v8  ;;  %v401_v10 = vadd.f32 0.0036580483, %v400_v7 }
 0x194   : > { %v413_v11 = vmul.f32 %v412_v9, %v397_v2  ;;  %v402_v13 = vmul.f32 %v401_v10, %v397_v2 }
 0x196   : > { %v414_v12 = vadd.f32 0.112945676, %v413_v11  ;;  %v403_v14 = vadd.f32 0.05243302, %v402_v13 }
 0x198   : > { %v415_v15 = vmul.f32 %v414_v12, %v397_v2  ;;  %v404_v19 = vmul.f32 %v403_v14, %v397_v2 }
 0x19a   : > { %v416_v16 = vadd.f32 0.4994258, %v415_v15  ;;  %v405_v20 = vadd.f32 0.18741608, %v404_v19 }
 0x19c   : > { %v417_v17 = vmul.f32 %v416_v16, %v397_v2  ;;  %v406_v22 = vmul.f32 %v405_v20, %v397_v2 }
 0x19e   : > { %v418_v18 = vadd.f32 1.0, %v417_v17  ;;  %v407_v26 = vadd.f32 1.1283791, %v406_v22 }
 0x1a0   : > { %665 = vrcp.f32 %v418_v18  ;;  %v430_v25 = vand.u32 2147483648, %v418_v18  ;;  %v428_v28 = vand.u32 2147483647, %v418_v18  ;;  %vm424_vm5 = vweird.f32 %v418_v18 }
 0x1a1   : > { %v408_v31 = vmul.f32 %v407_v26, %v395_v0 }
 0x1a2   : > { %v431_v30 = vor.u32 1.1754944e-38, %v430_v25  ;;  %vm429_vm7 = vcmp.eq.f32.partialorder %v428_v28, 8.507059e+37 }
 0x1a6   : > { %v666_v21 = vpop.eup %665 }
 0x1a7   : > { %v420_v23 = vmul.f32 %v666_v21, %v418_v18  ;;  %vm425_vm4 = vweird.f32 %v666_v21 }
 0x1a8   : > { %vm426_vm6 = vmor %vm424_vm5, %vm425_vm4 }
 0x1a9   : > { %v421_v24 = vsub.f32 1.0, %v420_v23 }
 0x1ab   : > { %v422_v27 = vmul.f32 %v666_v21, %v421_v24 }
 0x1ad   : > { %v423_v29 = vadd.f32 %v666_v21, %v422_v27 }
 0x1af   : > { %v427_v32 = vsel %vm426_vm6, %v666_v21, %v423_v29 }
 0x1b0   : > { %v432_v33 = vsel %vm429_vm7, %v431_v30, %v427_v32 }
 0x1b1   : > { %v433_v34 = vmul.f32 %v432_v33, %v408_v31 }
 0x1b3   : > { %v576_v35 = vclamps-f32 %v433_v34, 1.0 }
 0x1b5   : > { %v436_v37 = vadd.f32 1.0, %v576_v35 }
 0x1b7   : > { %v437_v38 = vmul.f32 %v436_v37, %v394_v36 }
 0x1b9   : > { %438 = vst [vmem:[%s282_s28] sm:$0xff] %v437_v38 }
 0x1ba   : > { %784 = shalt.err (!%p781_p11)
}
 0x1bb   : > { %589 = dma.vmem_to_hbm [thread:$0]  (%p947_p2), %s454_s29, 128, %s456_s30, %s440_s18  }
 0x1bc PF: > { %p609_p12 = scmp.ge.s32.totalorder %s847_s20, 2  ;;  %s467_s7 = sand.u32 1, %s827_s15  }
 0x1bd   : > { %s468_s17 = scalar_lea.sflag [#allocation4], %s467_s7 }
 0x1be   : > { %p603_p13 = pnand %p609_p12, %p955_p5 }
 0x1c0   : > { %p604_p0 = pneg %p603_p13 }
 0x1c2   : > { %822 = dma.done.wait (%p604_p0), %s468_s17, 128  }
 0x1c3   : > { %824 = vsyncadd (%p604_p0), %s468_s17, 4294967168  ;;  %s23_s20 = sadd.s32 1, %s847_s20   ;;  %s1058_s25 = sld [smem:[#allocation13_spill]] }
 0x1c4   : > { %p20_p4 = scmp.ge.s32.totalorder %s23_s20, 6   ;;  %s1059_s17 = sld [smem:[#allocation15_spill]] }
 0x1c5   : > { %s1060_s10 = sld [smem:[#allocation14_spill]]  ;;  %s1061_s15 = smov %s831_s16 }
 0x1c6   : > { %s1063_s18 = smov %s843_s19 }
 0x1c7   :  { %22 = sbr.rel (!%p20_p4) target bundleno = 10 (0xa), region = 98 }
 0x1c9   : > { %s1062_s16 = smov %s1058_s25 }
 0x1cb   : > { %s1064_s19 = smov %s1060_s10 }
 0x1cc   :  { %474 = vsyncpa [#allocation3], 1 }
 0x1cd   :  { %476 = vsyncpa [#allocation3 + $0x1], 1 }
 0x1ce   :  { %477 = vsyncpa [#allocation6], 1 }
 0x1cf   :  { %479 = vsyncpa [#allocation6 + $0x1], 1 }
 0x1d0   :  { %480 = vsyncpa [#allocation4], 1 }
 0x1d1   :  { %482 = vsyncpa [#allocation4 + $0x1], 1 }

</bundles_post_ra>
